<compile_context>
chip_gen: v7x
topology: tpu7x:2x2x1
jax: 0.10.0
libtpu: 0.0.40
codegen_flags: <defaults>
</compile_context>

<pallas_src>
import functools
import math

import jax
import jax.numpy as jnp
from jax import lax
from jax.experimental import pallas as pl
from jax.experimental.pallas import tpu as pltpu

EMBED_DIM = 128      # lane-aligned CLIP-style embedding dim
HIDDEN_DIM = 128     # prior network hidden width (lane aligned)
TIMESTEPS = 1000     # diffusion timesteps
MAX_CHUNK = 1024     # rows per grid step (VMEM-safe on v5e/v6e/v7x)


def _round_up(x, m):
    return (x + m - 1) // m * m


# ----------------------------------------------------------------------------
# Pallas kernel: one grid step == one batch chunk
#   x_noisy = sqrt(ac_t) * x_start + sqrt(1 - ac_t) * noise
#   pred    = MLP([x_noisy ; text_embed ; time_emb])      (predict_x_start)
#   out[i]  = sum over valid rows of (pred - x_start)^2   (unscaled, broadcast
#             into a tile-aligned (8,128) block)
# ----------------------------------------------------------------------------
def _prior_loss_kernel(img_ref, noise_ref, ctx_ref, sac_ref, s1ac_ref,
                       w1x_ref, w1c_ref, b1_ref, w2_ref, b2_ref, loss_ref,
                       *, batch, chunk):
    x_start = img_ref[...]                               # (C, D) f32, pre-scaled
    # q_sample in f32 on the VPU (safe on v5e too)
    x_noisy = sac_ref[...] * x_start + s1ac_ref[...] * noise_ref[...]

    # Two accumulated MXU dots (bf16 operands, single f32 accumulator) — no
    # in-kernel concat, weights stay resident across the whole grid.
    h = jnp.dot(x_noisy.astype(jnp.bfloat16), w1x_ref[...],
                preferred_element_type=jnp.float32)
    h += jnp.dot(ctx_ref[...], w1c_ref[...],
                 preferred_element_type=jnp.float32)
    h = jnp.maximum(h + b1_ref[...], 0.0)                # ReLU (f32, VPU)
    pred = jnp.dot(h.astype(jnp.bfloat16), w2_ref[...],
                   preferred_element_type=jnp.float32) + b2_ref[...]

    # Mask padded rows of the last chunk (batch is a compile-time constant).
    row_id = (lax.broadcasted_iota(jnp.int32, (chunk, 1), 0)
              + pl.program_id(0) * chunk)
    valid = (row_id < batch).astype(jnp.float32)
    diff = (pred - x_start) * valid
    ssq = jnp.sum(diff * diff, keepdims=True)            # (1, 1) raw sum of squares

    # Per-step blocked, tile-aligned output (parallel-safe across TCs on v7x).
    loss_ref[0] = jnp.broadcast_to(ssq, (8, 128))


def _prior_loss_call(img, noise, ctx, sac, s1ac, params, *,
                     batch, num_chunks, chunk):
    D, H = EMBED_DIM, HIDDEN_DIM
    row = lambda i: (i, 0)       # per-chunk batch tile
    res = lambda i: (0, 0)       # weights: same block every step -> VMEM-resident

    kernel = functools.partial(_prior_loss_kernel, batch=batch, chunk=chunk)

    return pl.pallas_call(
        kernel,
        out_shape=jax.ShapeDtypeStruct((num_chunks, 8, 128), jnp.float32),
        grid=(num_chunks,),
        in_specs=[
            pl.BlockSpec((chunk, D), row),          # scaled image embed (f32)
            pl.BlockSpec((chunk, D), row),          # noise (f32)
            pl.BlockSpec((chunk, 2 * D), row),      # [text_embed ; time_emb] (bf16)
            pl.BlockSpec((chunk, 1), row),          # sqrt(alpha_cumprod)
            pl.BlockSpec((chunk, 1), row),          # sqrt(1 - alpha_cumprod)
            pl.BlockSpec((D, H), res),              # w1 (x_noisy slice, bf16)
            pl.BlockSpec((2 * D, H), res),          # w1 (context slice, bf16)
            pl.BlockSpec((1, H), res),              # b1 (f32)
            pl.BlockSpec((H, D), res),              # w2 (bf16)
            pl.BlockSpec((1, D), res),              # b2 (f32)
        ],
        out_specs=pl.BlockSpec((1, 8, 128), lambda i: (i, 0, 0)),
        compiler_params=pltpu.CompilerParams(
            dimension_semantics=("parallel",)),
    )(img, noise, ctx, sac, s1ac,
      params["w1x"], params["w1c"], params["b1"], params["w2"], params["b2"])


# ----------------------------------------------------------------------------
# Plain-JAX glue
# ----------------------------------------------------------------------------
def _sinusoidal_time_emb(t, dim):
    half = dim // 2
    freqs = jnp.exp(-math.log(10000.0) * jnp.arange(half, dtype=jnp.float32) / half)
    args = t.astype(jnp.float32)[:, None] * freqs[None, :]
    return jnp.concatenate([jnp.sin(args), jnp.cos(args)], axis=-1)   # (B, dim)


class DiffusionPriorTrainerPallas:
    """Forward-pass-only port of DiffusionPriorTrainer."""

    def __init__(self, key):
        k1, k2 = jax.random.split(key, 2)
        din = 3 * EMBED_DIM
        w1 = (jax.random.normal(k1, (din, HIDDEN_DIM), jnp.float32)
              / math.sqrt(din))
        w2 = (jax.random.normal(k2, (HIDDEN_DIM, EMBED_DIM), jnp.float32)
              / math.sqrt(HIDDEN_DIM))
        self.params = {
            # bf16 weights: half the DMA bytes, MXU-native on v6e/v7x
            "w1x": w1[:EMBED_DIM].astype(jnp.bfloat16),       # acts on x_noisy
            "w1c": w1[EMBED_DIM:].astype(jnp.bfloat16),       # acts on [text;temb]
            "b1": jnp.zeros((1, HIDDEN_DIM), jnp.float32),
            "w2": w2.astype(jnp.bfloat16),
            "b2": jnp.zeros((1, EMBED_DIM), jnp.float32),
        }
        # linear beta schedule
        betas = jnp.linspace(1e-4, 2e-2, TIMESTEPS, dtype=jnp.float32)
        alphas_cumprod = jnp.cumprod(1.0 - betas)
        self.sqrt_ac = jnp.sqrt(alphas_cumprod)
        self.sqrt_1mac = jnp.sqrt(1.0 - alphas_cumprod)
        self.image_embed_scale = EMBED_DIM ** 0.5
        self.step = 0  # mirrors the registered `step` buffer

    def forward(self, image_embed, text_embed, *, max_batch_size=None, key):
        # NOTE: max_batch_size only controlled chunking in the PyTorch trainer;
        # the chunk_frac-weighted sum of per-chunk MSE means is mathematically
        # identical to the global mean, so the kernel picks its own (large) tile.
        del max_batch_size
        batch = image_embed.shape[0]

        # kernel tile: as large as possible (amortize grid overhead, fill the
        # MXU along M) while staying VMEM-safe on v7x; multiple of 16 for the
        # bf16 context stream.
        num_chunks = math.ceil(batch / MAX_CHUNK)
        chunk = _round_up(math.ceil(batch / num_chunks), 16)
        padded = num_chunks * chunk
        pad = padded - batch

        # whole-batch RNG once
        kt, kn = jax.random.split(key, 2)
        t = jax.random.randint(kt, (batch,), 0, TIMESTEPS)
        noise = jax.random.normal(kn, (batch, EMBED_DIM), jnp.float32)

        img_scaled = image_embed * self.image_embed_scale                # (B, D) f32
        sac = self.sqrt_ac[t][:, None]                                   # (B, 1)
        s1ac = self.sqrt_1mac[t][:, None]                                # (B, 1)
        temb = _sinusoidal_time_emb(t, EMBED_DIM)                        # (B, D)
        # matmul-only context: single bf16 stream (halves its HBM bytes)
        ctx = jnp.concatenate([text_embed, temb], axis=-1).astype(jnp.bfloat16)

        def padrows(x):
            return jnp.pad(x, ((0, pad), (0, 0))) if pad else x          # single pad

        partials = _prior_loss_call(
            padrows(img_scaled), padrows(noise), padrows(ctx),
            padrows(sac), padrows(s1ac), self.params,
            batch=batch, num_chunks=num_chunks, chunk=chunk)

        # sum_chunks mean_chunk * chunk_frac  ==  total_sum_sq / (batch * D)
        total_ssq = jnp.sum(partials[:, 0, 0])
        return total_ssq / jnp.float32(batch * EMBED_DIM)

    __call__ = forward


if __name__ == "__main__":
    key = jax.random.PRNGKey(0)
    k_param, k_img, k_txt, k_fwd = jax.random.split(key, 4)

    trainer = DiffusionPriorTrainerPallas(k_param)

    batch = 16
    image_embed = jax.random.normal(k_img, (batch, EMBED_DIM), jnp.float32)
    text_embed = jax.random.normal(k_txt, (batch, EMBED_DIM), jnp.float32)
    # l2-normalize, as CLIP embeddings would be
    image_embed = image_embed / jnp.linalg.norm(image_embed, axis=-1, keepdims=True)
    text_embed = text_embed / jnp.linalg.norm(text_embed, axis=-1, keepdims=True)

    total_loss = trainer(image_embed, text_embed, max_batch_size=8, key=k_fwd)
    total_loss = jax.block_until_ready(total_loss)
    assert jnp.isfinite(total_loss)
    print("KERNEL_OK")
</pallas_src>

<mosaic_0001>
module attributes {stable_mosaic.version = 11 : i64} {
  func.func @_prior_loss_kernel(%arg0: i32, %arg1: memref<16x128xf32, #tpu.memory_space<vmem>>, %arg2: memref<16x128xf32, #tpu.memory_space<vmem>>, %arg3: memref<16x256xbf16, #tpu.memory_space<vmem>>, %arg4: memref<16x1xf32, #tpu.memory_space<vmem>>, %arg5: memref<16x1xf32, #tpu.memory_space<vmem>>, %arg6: memref<128x128xbf16, #tpu.memory_space<vmem>>, %arg7: memref<256x128xbf16, #tpu.memory_space<vmem>>, %arg8: memref<1x128xf32, #tpu.memory_space<vmem>>, %arg9: memref<128x128xbf16, #tpu.memory_space<vmem>>, %arg10: memref<1x128xf32, #tpu.memory_space<vmem>>, %arg11: memref<1x8x128xf32, #tpu.memory_space<vmem>>) attributes {dimension_semantics = [#tpu.dimension_semantics<parallel>], iteration_bounds = array<i64: 1>, scalar_prefetch = 0 : i64, scratch_operands = 0 : i64, tpu.core_type = #tpu.core_type<tc>, window_params = [{transform_indices = @transform_0, window_bounds = array<i64: 16, 128>}, {transform_indices = @transform_1, window_bounds = array<i64: 16, 128>}, {transform_indices = @transform_2, window_bounds = array<i64: 16, 256>}, {transform_indices = @transform_3, window_bounds = array<i64: 16, 1>}, {transform_indices = @transform_4, window_bounds = array<i64: 16, 1>}, {pipeline_mode = #tpu.pipeline_mode<synchronous>, transform_indices = @transform_5, window_bounds = array<i64: 128, 128>}, {pipeline_mode = #tpu.pipeline_mode<synchronous>, transform_indices = @transform_6, window_bounds = array<i64: 256, 128>}, {pipeline_mode = #tpu.pipeline_mode<synchronous>, transform_indices = @transform_7, window_bounds = array<i64: 1, 128>}, {pipeline_mode = #tpu.pipeline_mode<synchronous>, transform_indices = @transform_8, window_bounds = array<i64: 128, 128>}, {pipeline_mode = #tpu.pipeline_mode<synchronous>, transform_indices = @transform_9, window_bounds = array<i64: 1, 128>}, {transform_indices = @transform_10, window_bounds = array<i64: 1, 8, 128>}]} {
    %c0 = arith.constant 0 : index
    %c0_0 = arith.constant 0 : index
    %0 = vector.load %arg1[%c0, %c0_0] : memref<16x128xf32, #tpu.memory_space<vmem>>, vector<16x128xf32>
    %c0_1 = arith.constant 0 : index
    %c0_2 = arith.constant 0 : index
    %1 = vector.load %arg4[%c0_1, %c0_2] : memref<16x1xf32, #tpu.memory_space<vmem>>, vector<16x1xf32>
    %2 = vector.broadcast %1 : vector<16x1xf32> to vector<16x128xf32>
    %3 = arith.mulf %2, %0 : vector<16x128xf32>
    %c0_3 = arith.constant 0 : index
    %c0_4 = arith.constant 0 : index
    %4 = vector.load %arg5[%c0_3, %c0_4] : memref<16x1xf32, #tpu.memory_space<vmem>>, vector<16x1xf32>
    %c0_5 = arith.constant 0 : index
    %c0_6 = arith.constant 0 : index
    %5 = vector.load %arg2[%c0_5, %c0_6] : memref<16x128xf32, #tpu.memory_space<vmem>>, vector<16x128xf32>
    %6 = vector.broadcast %4 : vector<16x1xf32> to vector<16x128xf32>
    %7 = arith.mulf %6, %5 : vector<16x128xf32>
    %8 = arith.addf %3, %7 : vector<16x128xf32>
    %9 = arith.truncf %8 : vector<16x128xf32> to vector<16x128xbf16>
    %c0_7 = arith.constant 0 : index
    %c0_8 = arith.constant 0 : index
    %10 = vector.load %arg6[%c0_7, %c0_8] : memref<128x128xbf16, #tpu.memory_space<vmem>>, vector<128x128xbf16>
    %cst = arith.constant dense<0.000000e+00> : vector<16x128xf32>
    %11 = tpu.matmul %9, %10, %cst {dimension_numbers = #tpu.dot_dimension_numbers<[1], [0], [0], [1], [0, 0, 1, 1], [], []>} : vector<16x128xbf16>, vector<128x128xbf16>, vector<16x128xf32> -> vector<16x128xf32>
    %c0_9 = arith.constant 0 : index
    %c0_10 = arith.constant 0 : index
    %12 = vector.load %arg3[%c0_9, %c0_10] : memref<16x256xbf16, #tpu.memory_space<vmem>>, vector<16x256xbf16>
    %c0_11 = arith.constant 0 : index
    %c0_12 = arith.constant 0 : index
    %13 = vector.load %arg7[%c0_11, %c0_12] : memref<256x128xbf16, #tpu.memory_space<vmem>>, vector<256x128xbf16>
    %cst_13 = arith.constant dense<0.000000e+00> : vector<16x128xf32>
    %14 = tpu.matmul %12, %13, %cst_13 {dimension_numbers = #tpu.dot_dimension_numbers<[1], [0], [0], [1], [0, 0, 1, 1], [], []>} : vector<16x256xbf16>, vector<256x128xbf16>, vector<16x128xf32> -> vector<16x128xf32>
    %15 = arith.addf %11, %14 : vector<16x128xf32>
    %c0_14 = arith.constant 0 : index
    %c0_15 = arith.constant 0 : index
    %16 = vector.load %arg8[%c0_14, %c0_15] : memref<1x128xf32, #tpu.memory_space<vmem>>, vector<1x128xf32>
    %17 = vector.broadcast %16 : vector<1x128xf32> to vector<16x128xf32>
    %18 = arith.addf %15, %17 : vector<16x128xf32>
    %cst_16 = arith.constant 0.000000e+00 : f32
    %19 = vector.broadcast %cst_16 : f32 to vector<16x128xf32>
    %20 = arith.maximumf %18, %19 : vector<16x128xf32>
    %21 = arith.truncf %20 : vector<16x128xf32> to vector<16x128xbf16>
    %c0_17 = arith.constant 0 : index
    %c0_18 = arith.constant 0 : index
    %22 = vector.load %arg9[%c0_17, %c0_18] : memref<128x128xbf16, #tpu.memory_space<vmem>>, vector<128x128xbf16>
    %cst_19 = arith.constant dense<0.000000e+00> : vector<16x128xf32>
    %23 = tpu.matmul %21, %22, %cst_19 {dimension_numbers = #tpu.dot_dimension_numbers<[1], [0], [0], [1], [0, 0, 1, 1], [], []>} : vector<16x128xbf16>, vector<128x128xbf16>, vector<16x128xf32> -> vector<16x128xf32>
    %c0_20 = arith.constant 0 : index
    %c0_21 = arith.constant 0 : index
    %24 = vector.load %arg10[%c0_20, %c0_21] : memref<1x128xf32, #tpu.memory_space<vmem>>, vector<1x128xf32>
    %25 = vector.broadcast %24 : vector<1x128xf32> to vector<16x128xf32>
    %26 = arith.addf %23, %25 : vector<16x128xf32>
    %27 = tpu.iota {dimensions = array<i32: 0>} : vector<16x1xi32>
    %c16_i32 = arith.constant 16 : i32
    %28 = arith.muli %arg0, %c16_i32 : i32
    %29 = vector.broadcast %28 : i32 to vector<16x1xi32>
    %30 = arith.addi %27, %29 : vector<16x1xi32>
    %c16_i32_22 = arith.constant 16 : i32
    %31 = vector.broadcast %c16_i32_22 : i32 to vector<16x1xi32>
    %32 = arith.cmpi slt, %30, %31 : vector<16x1xi32>
    %33 = arith.extui %32 : vector<16x1xi1> to vector<16x1xi32>
    %34 = arith.sitofp %33 : vector<16x1xi32> to vector<16x1xf32>
    %35 = arith.subf %26, %0 : vector<16x128xf32>
    %36 = vector.broadcast %34 : vector<16x1xf32> to vector<16x128xf32>
    %37 = arith.mulf %35, %36 : vector<16x128xf32>
    %38 = arith.mulf %37, %37 : vector<16x128xf32>
    %39 = vector.shape_cast %38 : vector<16x128xf32> to vector<1x16x128xf32>
    %cst_23 = arith.constant dense<0.000000e+00> : vector<1xf32>
    %40 = vector.multi_reduction <add>, %39, %cst_23 [1, 2] : vector<1x16x128xf32> to vector<1xf32>
    %41 = vector.shape_cast %40 : vector<1xf32> to vector<1x1x1xf32>
    %42 = vector.extract %41[0, 0, 0] : f32 from vector<1x1x1xf32>
    %43 = vector.broadcast %42 : f32 to vector<1x1xf32>
    %44 = vector.shape_cast %43 : vector<1x1xf32> to vector<1x1xf32>
    %45 = vector.broadcast %44 : vector<1x1xf32> to vector<8x128xf32>
    %c0_24 = arith.constant 0 : index
    %c0_25 = arith.constant 0 : index
    %c0_26 = arith.constant 0 : index
    %46 = vector.load %arg11[%c0_24, %c0_25, %c0_26] : memref<1x8x128xf32, #tpu.memory_space<vmem>>, vector<1x8x128xf32>
    %47 = vector.shape_cast %46 : vector<1x8x128xf32> to vector<8x128xf32>
    %48 = vector.shape_cast %45 : vector<8x128xf32> to vector<1x8x128xf32>
    tpu.vector_store %arg11[%c0_24, %c0_25, %c0_26], %48 {strides = array<i32>} : memref<1x8x128xf32, #tpu.memory_space<vmem>>, vector<1x8x128xf32>,
    return
  }
  func.func @transform_0(%arg0: i32) -> (i32, i32) {
    %c0_i32 = arith.constant 0 : i32
    %c0_i32_0 = arith.constant 0 : i32
    return %arg0, %c0_i32 : i32, i32
  }
  func.func @transform_1(%arg0: i32) -> (i32, i32) {
    %c0_i32 = arith.constant 0 : i32
    %c0_i32_0 = arith.constant 0 : i32
    return %arg0, %c0_i32 : i32, i32
  }
  func.func @transform_2(%arg0: i32) -> (i32, i32) {
    %c0_i32 = arith.constant 0 : i32
    %c0_i32_0 = arith.constant 0 : i32
    return %arg0, %c0_i32 : i32, i32
  }
  func.func @transform_3(%arg0: i32) -> (i32, i32) {
    %c0_i32 = arith.constant 0 : i32
    %c0_i32_0 = arith.constant 0 : i32
    return %arg0, %c0_i32 : i32, i32
  }
  func.func @transform_4(%arg0: i32) -> (i32, i32) {
    %c0_i32 = arith.constant 0 : i32
    %c0_i32_0 = arith.constant 0 : i32
    return %arg0, %c0_i32 : i32, i32
  }
  func.func @transform_5(%arg0: i32) -> (i32, i32) {
    %c0_i32 = arith.constant 0 : i32
    %c0_i32_0 = arith.constant 0 : i32
    %c0_i32_1 = arith.constant 0 : i32
    return %c0_i32, %c0_i32_0 : i32, i32
  }
  func.func @transform_6(%arg0: i32) -> (i32, i32) {
    %c0_i32 = arith.constant 0 : i32
    %c0_i32_0 = arith.constant 0 : i32
    %c0_i32_1 = arith.constant 0 : i32
    return %c0_i32, %c0_i32_0 : i32, i32
  }
  func.func @transform_7(%arg0: i32) -> (i32, i32) {
    %c0_i32 = arith.constant 0 : i32
    %c0_i32_0 = arith.constant 0 : i32
    %c0_i32_1 = arith.constant 0 : i32
    return %c0_i32, %c0_i32_0 : i32, i32
  }
  func.func @transform_8(%arg0: i32) -> (i32, i32) {
    %c0_i32 = arith.constant 0 : i32
    %c0_i32_0 = arith.constant 0 : i32
    %c0_i32_1 = arith.constant 0 : i32
    return %c0_i32, %c0_i32_0 : i32, i32
  }
  func.func @transform_9(%arg0: i32) -> (i32, i32) {
    %c0_i32 = arith.constant 0 : i32
    %c0_i32_0 = arith.constant 0 : i32
    %c0_i32_1 = arith.constant 0 : i32
    return %c0_i32, %c0_i32_0 : i32, i32
  }
  func.func @transform_10(%arg0: i32) -> (i32, i32, i32) {
    %c0_i32 = arith.constant 0 : i32
    %c0_i32_0 = arith.constant 0 : i32
    %c0_i32_1 = arith.constant 0 : i32
    return %arg0, %c0_i32, %c0_i32_0 : i32, i32, i32
  }
}

</mosaic_0001>

<bundles_post_ra>
// kernel: tpu_custom_call.1
= control target key start
LH: loop header
LB: loop body
LE: loop exit
PB: predicated region body
PF: predicated region fallthrough
CT: control target
= control target key end

     0   :  { %15 = vsyncpa [#allocation3], 0  ;;  %s1185_s0 = inlined_call_operand.hbm [shape: f32[16,128], index: 0, kind: input, shape index: {}]   ;;  %s1186_s1 = inlined_call_operand.hbm [shape: f32[16,128], index: 1, kind: input, shape index: {}]   ;;  %s1187_s2 = inlined_call_operand.hbm [shape: bf16[16,256], index: 2, kind: input, shape index: {}]   ;;  %s1188_s3 = inlined_call_operand.vmem [shape: f32[16,1], index: 3, kind: input, shape index: {}]   ;;  %s1189_s4 = inlined_call_operand.vmem [shape: f32[16,1], index: 4, kind: input, shape index: {}]   ;;  %s1190_s5 = inlined_call_operand.hbm [shape: bf16[128,128], index: 5, kind: input, shape index: {}]   ;;  %s1191_s6 = inlined_call_operand.hbm [shape: bf16[256,128], index: 6, kind: input, shape index: {}]   ;;  %s1192_s7 = inlined_call_operand.hbm [shape: f32[1,128], index: 7, kind: input, shape index: {}]   ;;  %s1193_s8 = inlined_call_operand.vmem [shape: bf16[128,128], index: 8, kind: input, shape index: {}]   ;;  %s1194_s9 = inlined_call_operand.vmem [shape: f32[1,128], index: 9, kind: input, shape index: {}]   ;;  %s1195_s10 = inlined_call_operand.hbm [shape: f32[1,8,128], index: 10, kind: output, shape index: {}]  }
   0x1   :  { %16 = vsyncpa [#allocation6], 0 }
   0x2   :  { %17 = vsyncpa [#allocation9], 0 }
   0x3   :  { %18 = vsyncpa [#allocation12], 0 }
   0x4   :  { %19 = vsyncpa [#allocation4], 0  ;;  %s944_s13 = smov [#allocation5]   ;;  %s945_s15 = smov [#allocation8]  }
   0x5   :  { %s37_s14 = sshll.u32 %s944_s13, 4  ;;  %s65_s16 = sshll.u32 %s945_s15, 4  ;;  %s38_s14 = int_to_ptr.vmem [resolvable:$true] %s37_s14  ;;  %s1013_s16 = int_to_ptr.vmem [resolvable:$true] %s65_s16 }
   0x6   :  { %s780_s19 = scalar_lea.hbm %s1186_s1, 256 }
   0x7   :  { %p781_p0 = scmp.ne.s32.totalorder %s1186_s1, %s780_s19  ;;  %p784_p1 = scmp.lt.u32.totalorder %s780_s19, %s1186_s1 }
   0x9   :  { %p786_p2 = pnand %p784_p1, %p781_p0 }
   0xb   :  { %789 = shalt.err (!%p786_p2)
}
   0xc   :  { %s790_s24 = scalar_lea.vmem %s38_s14, 256  ;;  %p795_p4 = scmp.lt.s32.totalorder %s38_s14, %s38_s14 }
   0xd   :  { %p791_p3 = scmp.ne.s32.totalorder %s38_s14, %s790_s24  ;;  %p796_p5 = scmp.lt.s32.totalorder %s790_s24, %s790_s24 }
   0xf   :  { %p797_p6 = por %p796_p5, %p795_p4 }
  0x11   :  { %p798_p7 = pnand %p797_p6, %p791_p3 }
  0x13   :  { %801 = shalt.err (!%p798_p7)
}
  0x14   :  { %s946_s25 = smov 128   ;;  %s947_s26 = smov 8  }
  0x15   :  { %43 = dma.hbm_to_vmem [thread:$0]  %s1186_s1, 256, %s38_s14, [#allocation6], %s946_s25, %s946_s25, %s947_s26  }
  0x16   :  { %s802_s11 = scalar_lea.hbm %s1190_s5, 1024 }
  0x17   :  { %p803_p8 = scmp.ne.s32.totalorder %s1190_s5, %s802_s11  ;;  %p806_p9 = scmp.lt.u32.totalorder %s802_s11, %s1190_s5 }
  0x19   :  { %p808_p10 = pnand %p806_p9, %p803_p8 }
  0x1b   :  { %811 = shalt.err (!%p808_p10)
}
  0x1c   :  { %s812_s18 = scalar_lea.vmem %s1013_s16, 1024  ;;  %p817_p12 = scmp.lt.s32.totalorder %s1013_s16, %s1013_s16 }
  0x1d   :  { %p813_p11 = scmp.ne.s32.totalorder %s1013_s16, %s812_s18  ;;  %p818_p13 = scmp.lt.s32.totalorder %s812_s18, %s812_s18 }
  0x1f   :  { %p819_p0 = por %p818_p13, %p817_p12 }
  0x21   :  { %p820_p1 = pnand %p819_p0, %p813_p11 }
  0x23   :  { %823 = shalt.err (!%p820_p1)
}
  0x24   :  { %s948_s1 = smov 64   ;;  %s949_s14 = smov 4  }
  0x25   :  { %71 = dma.hbm_to_vmem [thread:$0]  %s1190_s5, 1024, %s1013_s16, [#allocation9], %s948_s1, %s948_s1, %s949_s14  }
  0x26   :  { %s950_s21 = smov [#allocation2]   ;;  %s951_s23 = smov [#allocation7]  }
  0x27   :  { %s25_s22 = sshll.u32 %s950_s21, 4  ;;  %s49_s24 = sshll.u32 %s951_s23, 4  ;;  %s26_s22 = int_to_ptr.vmem [resolvable:$true] %s25_s22  ;;  %s1050_s24 = int_to_ptr.vmem [resolvable:$true] %s49_s24 }
  0x28   :  { %s824_s29 = scalar_lea.hbm %s1185_s0, 256 }
  0x29   :  { %p825_p2 = scmp.ne.s32.totalorder %s1185_s0, %s824_s29  ;;  %p828_p3 = scmp.lt.u32.totalorder %s824_s29, %s1185_s0 }
  0x2b   :  { %p830_p4 = pnand %p828_p3, %p825_p2 }
  0x2d   :  { %833 = shalt.err (!%p830_p4)
}
  0x2e   :  { %s834_s5 = scalar_lea.vmem %s26_s22, 256  ;;  %p839_p6 = scmp.lt.s32.totalorder %s26_s22, %s26_s22 }
  0x2f   :  { %p835_p5 = scmp.ne.s32.totalorder %s26_s22, %s834_s5  ;;  %p840_p7 = scmp.lt.s32.totalorder %s834_s5, %s834_s5 }
  0x31   :  { %p841_p8 = por %p840_p7, %p839_p6 }
  0x33   :  { %p842_p9 = pnand %p841_p8, %p835_p5 }
  0x35   :  { %845 = shalt.err (!%p842_p9)
}
  0x36   :  { %31 = dma.hbm_to_vmem [thread:$0]  %s1185_s0, 256, %s26_s22, [#allocation3], %s946_s25, %s946_s25, %s947_s26  }
  0x37   :  { %s846_s19 = scalar_lea.hbm %s1187_s2, 256 }
  0x38   :  { %p847_p10 = scmp.ne.s32.totalorder %s1187_s2, %s846_s19  ;;  %p850_p11 = scmp.lt.u32.totalorder %s846_s19, %s1187_s2 }
  0x3a   :  { %p852_p12 = pnand %p850_p11, %p847_p10 }
  0x3c   :  { %855 = shalt.err (!%p852_p12)
}
  0x3d   :  { %s856_s28 = scalar_lea.vmem %s1050_s24, 256  ;;  %p861_p0 = scmp.lt.s32.totalorder %s1050_s24, %s1050_s24 }
  0x3e   :  { %p857_p13 = scmp.ne.s32.totalorder %s1050_s24, %s856_s28  ;;  %p862_p1 = scmp.lt.s32.totalorder %s856_s28, %s856_s28 }
  0x40   :  { %p863_p2 = por %p862_p1, %p861_p0 }
  0x42   :  { %p864_p3 = pnand %p863_p2, %p857_p13 }
  0x44   :  { %867 = shalt.err (!%p864_p3)
}
  0x45   :  { %55 = dma.hbm_to_vmem [thread:$0]  %s1187_s2, 256, %s1050_s24, [#allocation6], %s946_s25, %s946_s25, %s947_s26  }
  0x46   :  { %s952_s29 = smov [#allocation10]   ;;  %s953_s11 = smov [#allocation11]  }
  0x47   :  { %s77_s30 = sshll.u32 %s952_s29, 4  ;;  %s90_s12 = sshll.u32 %s953_s11, 4  ;;  %s78_s30 = int_to_ptr.vmem [resolvable:$true] %s77_s30  ;;  %s91_s12 = int_to_ptr.vmem [resolvable:$true] %s90_s12 }
  0x48   :  { %s868_s16 = scalar_lea.hbm %s1191_s6, 2048 }
  0x49   :  { %p869_p4 = scmp.ne.s32.totalorder %s1191_s6, %s868_s16  ;;  %p872_p5 = scmp.lt.u32.totalorder %s868_s16, %s1191_s6 }
  0x4b   :  { %p874_p6 = pnand %p872_p5, %p869_p4 }
  0x4d   :  { %877 = shalt.err (!%p874_p6)
}
  0x4e   :  { %s878_s2 = scalar_lea.vmem %s78_s30, 2048  ;;  %p883_p8 = scmp.lt.s32.totalorder %s78_s30, %s78_s30 }
  0x4f   :  { %p879_p7 = scmp.ne.s32.totalorder %s78_s30, %s878_s2  ;;  %p884_p9 = scmp.lt.s32.totalorder %s878_s2, %s878_s2 }
  0x51   :  { %p885_p10 = por %p884_p9, %p883_p8 }
  0x53   :  { %p886_p11 = pnand %p885_p10, %p879_p7 }
  0x55   :  { %889 = shalt.err (!%p886_p11)
}
  0x56   :  { %83 = dma.hbm_to_vmem [thread:$0]  %s1191_s6, 2048, %s78_s30, [#allocation9], %s948_s1, %s948_s1, %s949_s14  }
  0x57   :  { %s890_s21 = scalar_lea.hbm %s1192_s7, 16 }
  0x58   :  { %p891_p12 = scmp.ne.s32.totalorder %s1192_s7, %s890_s21  ;;  %p894_p13 = scmp.lt.u32.totalorder %s890_s21, %s1192_s7 }
  0x5a   :  { %p896_p0 = pnand %p894_p13, %p891_p12 }
  0x5c   :  { %899 = shalt.err (!%p896_p0)
}
  0x5d   :  { %s900_s22 = scalar_lea.vmem %s91_s12, 16  ;;  %s904_s29 = scalar_lea.vmem %s91_s12, 32 }
  0x5e   :  { %p901_p1 = scmp.ne.s32.totalorder %s91_s12, %s900_s22  ;;  %p905_p2 = scmp.lt.s32.totalorder %s91_s12, %s91_s12 }
  0x5f   :  { %p906_p3 = scmp.lt.s32.totalorder %s904_s29, %s900_s22 }
  0x61   :  { %p907_p4 = por %p906_p3, %p905_p2 }
  0x63   :  { %p908_p5 = pnand %p907_p4, %p901_p1 }
  0x65   :  { %911 = shalt.err (!%p908_p5)
}
  0x66   :  { %93 = dma.hbm_to_vmem [thread:$0]  %s1192_s7, 16, %s91_s12, [#allocation12]  }
  0x67   :  { %934 = dma.done.wait [#allocation3], 256  }
  0x68   :  { %935 = vsyncadd [#allocation3], 4294967040 }
  0x69   :  { %936 = dma.done.wait [#allocation6], 512  }
  0x6a   :  { %937 = vsyncadd [#allocation6], 4294966784 }
  0x6b   :  { %938 = dma.done.wait [#allocation9], 3072  }
  0x6c   :  { %939 = vsyncadd [#allocation9], 4294964224 }
  0x6d   :  { %940 = dma.done.wait [#allocation12], 16  }
  0x6e   :  { %941 = vsyncadd [#allocation12], 4294967280  ;;  %v954_v0 = vmov 0   ;;  %v955_v1 = vmov 0.0   ;;  %v133_v2 = vld [vmem:[%s1189_s4] sm:$0xff]  ;;  %v134_v4 = vld [vmem:[%s1189_s4 + $0x8] sm:$0xff] }
  0x6f   :  { %744 = vset.pattern.permute.xlu1 %v954_v0  ;;  %743 = vset.pattern.permute.xlu0 %v954_v0  ;;  %v119_v3 = vld [vmem:[%s1188_s3] sm:$0xff]  ;;  %v120_v5 = vld [vmem:[%s1188_s3 + $0x8] sm:$0xff]  ;;  %v745_v6 = vld [vmem:[#allocation10 + $0x40] sm:$0xff]   ;;  %vm956_vm0 = vmmov 0  }
  0x70   :  { %687 = vmatprep.subr.bf16.mxu1 %v955_v1  ;;  %139 = vperm.xlu1 %744, %v133_v2   ;;  %v746_v7 = vld [vmem:[#allocation10] sm:$0xff]   ;;  %v747_v8 = vld [vmem:[#allocation10 + $0x48] sm:$0xff]   ;;  %v750_v11 = vld [vmem:[#allocation10 + $0x50] sm:$0xff]  }
  0x71   :  { %123 = vperm.xlu0 %743, %v119_v3   ;;  %647 = vmatprep.subr.bf16.mxu0 %v745_v6  ;;  %v748_v9 = vld [vmem:[#allocation10 + $0x8] sm:$0xff]   ;;  %v749_v10 = vld [vmem:[#allocation8] sm:$0xff]   ;;  %v751_v13 = vld [vmem:[#allocation10 + $0x10] sm:$0xff]  }
  0x72   :  { %648 = vmatpush3.bf16.msra.mxu0 %v746_v7  ;;  %688 = vmatpush3.bf16.msra.mxu1 %v749_v10  ;;  %v752_v12 = vld [vmem:[#allocation8 + $0x8] sm:$0xff]   ;;  %v753_v14 = vld [vmem:[#allocation10 + $0x58] sm:$0xff]   ;;  %v755_v15 = vld [vmem:[#allocation8 + $0x10] sm:$0xff]  }
  0x73   :  { %649 = vmatprep.subr.bf16.mxu0 %v747_v8  ;;  %703 = vmatprep.mubr.msk.bf16.mxu1 %vm956_vm0, %v955_v1  ;;  %v754_v16 = vld [vmem:[#allocation10 + $0x18] sm:$0xff]   ;;  %v756_v17 = vld [vmem:[#allocation10 + $0x60] sm:$0xff]   ;;  %v759_v20 = vld [vmem:[#allocation10 + $0x68] sm:$0xff]  }
  0x74   :  { %144 = vperm.xlu1 %744, %v134_v4   ;;  %689 = vmatprep.subr.bf16.mxu1 %v955_v1  ;;  %v758_v18 = vld [vmem:[#allocation8 + $0x18] sm:$0xff]   ;;  %v757_v19 = vld [vmem:[#allocation10 + $0x20] sm:$0xff]   ;;  %v760_v22 = vld [vmem:[#allocation10 + $0x28] sm:$0xff]  }
  0x75   :  { %128 = vperm.xlu0 %743, %v120_v5   ;;  %v761_v21 = vld [vmem:[#allocation8 + $0x20] sm:$0xff]   ;;  %v762_v23 = vld [vmem:[#allocation10 + $0x70] sm:$0xff]   ;;  %v764_v24 = vld [vmem:[#allocation8 + $0x28] sm:$0xff]  }
  0x76   :  { %650 = vmatpush3.bf16.msra.mxu0 %v748_v9  ;;  %690 = vmatpush3.bf16.msra.mxu1 %v752_v12  ;;  %v769_v25 = vld [vmem:[#allocation7 + $0x4] ss:$8 sps:$4 sm:$0xff]   ;;  %v767_v30 = vld [vmem:[#allocation7] ss:$8 sps:$4 sm:$0xff]   ;;  %v774_v34 = vld [vmem:[%s1193_s8 + $0x10] sm:$0xff]  }
  0x77   :  { %651 = vmatprep.subr.bf16.mxu0 %v750_v11  ;;  %691 = vmatprep.subr.bf16.mxu1 %v955_v1  ;;  %v763_v26 = vld [vmem:[#allocation10 + $0x30] sm:$0xff]   ;;  %v765_v27 = vld [vmem:[#allocation10 + $0x78] sm:$0xff]   ;;  %v775_v35 = vld [vmem:[%s1193_s8 + $0x18] sm:$0xff]  }
  0x78   :  { %340 = vmatprep.mubr.bf16.mxu0 %v769_v25  ;;  %v770_v28 = vld [vmem:[#allocation8 + $0x30] sm:$0xff]   ;;  %v766_v29 = vld [vmem:[#allocation10 + $0x38] sm:$0xff]   ;;  %v135_v37 = vld [vmem:[#allocation5] sm:$0xff] }
  0x79   :  { %v771_v31 = vld [vmem:[#allocation8 + $0x38] sm:$0xff]   ;;  %v772_v32 = vld [vmem:[%s1193_s8] sm:$0xff]   ;;  %v136_v41 = vld [vmem:[#allocation5 + $0x8] sm:$0xff] }
  0x7a   :  { %652 = vmatpush3.bf16.msra.mxu0 %v751_v13  ;;  %692 = vmatpush3.bf16.msra.mxu1 %v755_v15  ;;  %v773_v33 = vld [vmem:[%s1193_s8 + $0x8] sm:$0xff]   ;;  %v776_v36 = vld [vmem:[%s1193_s8 + $0x20] sm:$0xff]   ;;  %v778_v53 = vld [vmem:[%s1193_s8 + $0x30] sm:$0xff]  }
  0x7b   :  { %653 = vmatprep.subr.bf16.mxu0 %v753_v14  ;;  %693 = vmatprep.subr.bf16.mxu1 %v955_v1  ;;  %v117_v40 = vld [vmem:[#allocation2] sm:$0xff]  ;;  %v118_v42 = vld [vmem:[#allocation2 + $0x8] sm:$0xff]  ;;  %v779_v54 = vld [vmem:[%s1193_s8 + $0x38] sm:$0xff]  }
  0x7c   :  { %v777_v52 = vld [vmem:[%s1193_s8 + $0x28] sm:$0xff]   ;;  %v637_v62 = vld [vmem:[#allocation11] ss:$0 sm:$0xff]  ;;  %v638_v9 = vld [vmem:[%s1194_s9] ss:$0 sm:$0xff]  ;;  %s957_s9 = smov [#allocation13]  }
  0x7d   :  { %s599_s29 = sshll.u32 %s957_s9, 4  ;;  %s600_s29 = int_to_ptr.vmem [resolvable:$true] %s599_s29 }
  0x7e   :  { %654 = vmatpush3.bf16.msra.mxu0 %v754_v16  ;;  %694 = vmatpush3.bf16.msra.mxu1 %v758_v18  ;;  %s912_s1 = scalar_lea.vmem %s600_s29, 128  ;;  %p917_p7 = scmp.lt.s32.totalorder %s600_s29, %s600_s29 }
  0x7f   :  { %655 = vmatprep.subr.bf16.mxu0 %v756_v17  ;;  %695 = vmatprep.subr.bf16.mxu1 %v955_v1  ;;  %p913_p6 = scmp.ne.s32.totalorder %s600_s29, %s912_s1  ;;  %p918_p8 = scmp.lt.s32.totalorder %s912_s1, %s912_s1 }
  0x81   :  { %p919_p9 = por %p918_p8, %p917_p7 }
  0x82   :  { %656 = vmatpush3.bf16.msra.mxu0 %v757_v19  ;;  %696 = vmatpush3.bf16.msra.mxu1 %v761_v21 }
  0x83   :  { %657 = vmatprep.subr.bf16.mxu0 %v759_v20  ;;  %697 = vmatprep.subr.bf16.mxu1 %v955_v1  ;;  %p920_p10 = pnand %p919_p9, %p913_p6 }
  0x86   :  { %658 = vmatpush3.bf16.msra.mxu0 %v760_v22  ;;  %698 = vmatpush3.bf16.msra.mxu1 %v764_v24 }
  0x87   :  { %659 = vmatprep.subr.bf16.mxu0 %v762_v23  ;;  %699 = vmatprep.subr.bf16.mxu1 %v955_v1 }
  0x8a   :  { %660 = vmatpush3.bf16.msra.mxu0 %v763_v26  ;;  %700 = vmatpush3.bf16.msra.mxu1 %v770_v28 }
  0x8b   :  { %661 = vmatprep.subr.bf16.mxu0 %v765_v27  ;;  %701 = vmatprep.subr.bf16.mxu1 %v955_v1 }
  0x8e   :  { %662 = vmatpush3.bf16.msra.mxu0 %v766_v29  ;;  %702 = vmatpush3.bf16.msra.mxu1 %v771_v31 }
  0x8f   :  { %707 = vmatprep.subr.bf16.mxu0 %v955_v1 }
  0x91   :  { %341 = vmatmul.mubr.bf16.vlgmr.msra.gmra.mrb[0].mxu0 %v767_v30 }
  0x92   :  { %708 = vmatpush3.bf16.msra.mxu0 %v772_v32  ;;  %723 = vmatprep.mubr.msk.bf16.mxu0 %vm956_vm0, %v955_v1 }
  0x93   :  { %709 = vmatprep.subr.bf16.mxu0 %v955_v1 }
  0x96   :  { %710 = vmatpush3.bf16.msra.mxu0 %v773_v33 }
  0x97   :  { %711 = vmatprep.subr.bf16.mxu0 %v955_v1 }
  0x9a   :  { %712 = vmatpush3.bf16.msra.mxu0 %v774_v34 }
  0x9b   :  { %713 = vmatprep.subr.bf16.mxu0 %v955_v1 }
  0x9e   :  { %714 = vmatpush3.bf16.msra.mxu0 %v775_v35 }
  0x9f   :  { %715 = vmatprep.subr.bf16.mxu0 %v955_v1 }
  0xa2   :  { %716 = vmatpush3.bf16.msra.mxu0 %v776_v36 }
  0xa3   :  { %717 = vmatprep.subr.bf16.mxu0 %v955_v1 }
  0xa6   :  { %718 = vmatpush3.bf16.msra.mxu0 %v777_v52 }
  0xa7   :  { %719 = vmatprep.subr.bf16.mxu0 %v955_v1 }
  0xaa   :  { %720 = vmatpush3.bf16.msra.mxu0 %v778_v53 }
  0xab   :  { %721 = vmatprep.subr.bf16.mxu0 %v955_v1 }
  0xae   :  { %722 = vmatpush3.bf16.msra.mxu0 %v779_v54 }
  0xef   :  { %v140_v38 = vpop.permute.xlu1 %139 }
  0xf0   :  { %v124_v39 = vpop.permute.xlu0 %123  ;;  %v147_v43 = vmul.f32 %v140_v38, %v135_v37 }
  0xf1   :  { %v131_v44 = vmul.f32 %v124_v39, %v117_v40 }
  0xf3   :  { %v145_v45 = vpop.permute.xlu1 %144  ;;  %v149_v49 = vadd.f32 %v147_v43, %v131_v44 }
  0xf4   :  { %v129_v46 = vpop.permute.xlu0 %128  ;;  %v148_v47 = vmul.f32 %v145_v45, %v136_v41 }
  0xf5   :  { %v132_v48 = vmul.f32 %v129_v46, %v118_v42 }
  0xf7   :  { %v150_v50 = vadd.f32 %v148_v47, %v132_v48 }
  0xf9   :  { %v151_v51 = vpack.c.bf16 %v150_v50, %v149_v49 }
  0xfb   :  { %704 = vmatmul.mubr.bf16.vlgmr.msra.gmra.mrb[0].mxu1 %v151_v51 }
 0x164   :  { %v663_v55 = vpop.f32.mrb[0].mxu0 }
 0x165   :  { %v664_v56 = vpop.f32.mrb[1].mxu0 }
 0x166   :  { %v665_v57 = vadd.f32 %v664_v56, %v663_v55  ;;  %v666_v58 = vpop.f32.mrb[2].mxu0 }
 0x167   :  { %v667_v59 = vpop.f32.mrb[3].mxu0 }
 0x168   :  { %v668_v60 = vadd.f32 %v667_v59, %v666_v58 }
 0x1ce   :  { %v431_v61 = vpop.f32.mrb[0].mxu1 }
 0x1cf   :  { %v432_v63 = vadd.f32 %v665_v57, %v431_v61  ;;  %v705_v0 = vpop.f32.mrb[1].mxu1 }
 0x1d0   :  { %v434_v2 = vpop.f32.mrb[2].mxu1 }
 0x1d1   :  { %v445_v3 = vadd.f32 %v637_v62, %v432_v63  ;;  %v435_v4 = vadd.f32 %v668_v60, %v434_v2  ;;  %v706_v5 = vpop.f32.mrb[3].mxu1 }
 0x1d3   :  { %v446_v1 = vadd.f32 %v637_v62, %v435_v4  ;;  %v447_v6 = vmax.f32 %v445_v3, 0.0 }
 0x1d5   :  { %v448_v7 = vmax.f32 %v446_v1, 0.0 }
 0x1d7   :  { %v449_v8 = vpack.c.bf16 %v448_v7, %v447_v6 }
 0x1d9   :  { %724 = vmatmul.mubr.bf16.vlgmr.msra.gmra.mrb[4].mxu0 %v449_v8 }
 0x2ac   :  { %v555_v10 = vpop.f32.mrb[4].mxu0 }
 0x2ad   :  { %v556_v11 = vadd.f32 %v638_v9, %v555_v10  ;;  %v725_v12 = vpop.f32.mrb[5].mxu0 }
 0x2ae   :  { %v558_v13 = vpop.f32.mrb[6].mxu0 }
 0x2af   :  { %v575_v14 = vsub.f32 %v556_v11, %v117_v40  ;;  %v559_v15 = vadd.f32 %v638_v9, %v558_v13  ;;  %v726_v16 = vpop.f32.mrb[7].mxu0 }
 0x2b1   :  { %v576_v17 = vsub.f32 %v559_v15, %v118_v42  ;;  %v579_v18 = vmul.f32 %v575_v14, %v575_v14 }
 0x2b3   :  { %v580_v19 = vmul.f32 %v576_v17, %v576_v17 }
 0x2b5   :  { %v581_v20 = vadd.f32 %v580_v19, %v579_v18 }
 0x2b7   :  { %582 = vadd.xlane.f32.xlu0 %v581_v20 }
 0x344   :  { %v583_v21 = vpop.xlane.xlu0 %582 }
 0x345   :  { %v584_v22 = vrot.slane %v583_v21, 4 }
 0x347   :  { %v585_v23 = vadd.f32 %v584_v22, %v583_v21 }
 0x349   :  { %v586_v24 = vrot.slane %v585_v23, 2 }
 0x34b   :  { %v587_v25 = vadd.f32 %v586_v24, %v585_v23 }
 0x34d   :  { %v588_v26 = vrot.slane %v587_v25, 1 }
 0x34f   :  { %v589_v27 = vadd.f32 %v588_v26, %v587_v25 }
 0x351   :  { %727 = vpush %v589_v27 }
 0x382   :  { %s728_s6 = spop %727 }
 0x383   :  { %v591_v28 = vstv %s728_s6 }
 0x384   :  { %592 = vst [vmem:[#allocation13] sm:$0xff] %v591_v28 }
 0x385   :  { %923 = shalt.err (!%p920_p10)
}
 0x386   :  { %s924_s11 = scalar_lea.hbm %s1195_s10, 128 }
 0x387   :  { %p925_p11 = scmp.ne.s32.totalorder %s1195_s10, %s924_s11  ;;  %p928_p12 = scmp.lt.u32.totalorder %s924_s11, %s1195_s10 }
 0x389   :  { %p930_p13 = pnand %p928_p12, %p925_p11 }
 0x38b   :  { %933 = shalt.err (!%p930_p13)
}
 0x38c   :  { %602 = dma.vmem_to_hbm [thread:$0]  %s600_s29, 128, %s1195_s10, [#allocation4]  }
 0x38d   :  { %942 = dma.done.wait [#allocation4], 128  }
 0x38e   :  { %943 = vsyncadd [#allocation4], 4294967168 }
 0x38f   :  { %606 = vsyncpa [#allocation3], 1 }
 0x390   :  { %607 = vsyncpa [#allocation6], 1 }
 0x391   :  { %608 = vsyncpa [#allocation9], 1 }
 0x392   :  { %609 = vsyncpa [#allocation12], 1 }
 0x393   :  { %610 = vsyncpa [#allocation4], 1 }

</bundles_post_ra>
